<compile_context>
chip_gen: v7x
topology: tpu7x:2x2x1
jax: 0.10.0
libtpu: 0.0.40
codegen_flags: <defaults>
</compile_context>

<pallas_src>
import jax
import jax.numpy as jnp
from jax.experimental import pallas as pl
from jax.experimental.pallas import tpu as pltpu


# ----------------------------- kernel body ---------------------------------


def _affine_kernel(x_ref, scale_ref, bias_ref, o_ref):
    # x_ref/o_ref: (r_blk, l_blk); scale_ref/bias_ref: (r_blk, 1) -> broadcast.
    o_ref[...] = x_ref[...] * scale_ref[...] + bias_ref[...]


# --------------------------- block-size chooser -----------------------------


def _divisors_mult(n, unit):
    """Divisors of n that are multiples of `unit`, ascending."""
    return [d for d in range(unit, n + 1, unit) if n % d == 0]


def _pick_block(dim, unit, target):
    """Pick a block extent along one dim.

    Returns the full extent if it is <= target (full extent is always a legal
    block), otherwise the largest divisor of `dim` that is a multiple of
    `unit` and <= target (falling back to the smallest legal divisor, or the
    full extent, if needed).
    """
    if dim <= target:
        return dim
    cands = _divisors_mult(dim, unit)
    if not cands:
        return dim
    at_or_below = [d for d in cands if d <= target]
    return at_or_below[-1] if at_or_below else cands[0]


# ------------------------------- wrapper ------------------------------------


def tensor_transform(x, mean, std, *, target_block_bytes=2 << 20):
    """y = ((x * 0.5 + 0.5) - mean_c) / std_c, NCHW layout.

    x:    [B, C, H, W] float32
    mean: [C] per-channel mean (the module's constant [C, res, res] map folded)
    std:  [C] per-channel std
    """
    B, C, H, W = x.shape
    mean = jnp.asarray(mean, x.dtype)
    std = jnp.asarray(std, x.dtype)
    assert mean.shape == (C,) and std.shape == (C,)

    # Fold the whole transform into one affine per channel (host-side, tiny).
    scale_c = (0.5 / std).astype(x.dtype)            # (C,)
    bias_c = ((0.5 - mean) / std).astype(x.dtype)    # (C,)

    BC, HW = B * C, H * W
    itemsize = jnp.dtype(x.dtype).itemsize
    target_elems = max(128, target_block_bytes // itemsize)

    # Lane-dense flattening: rows = (b, c) pairs, lanes = flattened spatial.
    x2 = x.reshape(BC, HW)
    scale_rows = jnp.tile(scale_c, B).reshape(BC, 1)  # row b*C+c -> scale_c
    bias_rows = jnp.tile(bias_c, B).reshape(BC, 1)

    # Block sizing: aim for ~target_block_bytes per x-block, lane dim a big
    # multiple of 128 (or the full extent), row dim a multiple of 8 (or full).
    l_blk = _pick_block(HW, 128, target_elems)
    rows_target = max(1, target_elems // l_blk)
    r_blk = _pick_block(BC, 8, rows_target)

    grid = (BC // r_blk, HW // l_blk)

    x_spec = pl.BlockSpec((r_blk, l_blk), lambda i, j: (i, j))
    out_spec = pl.BlockSpec((r_blk, l_blk), lambda i, j: (i, j))
    vec_spec = pl.BlockSpec((r_blk, 1), lambda i, j: (i, 0))  # tiny, row-aligned

    y2 = pl.pallas_call(
        _affine_kernel,
        out_shape=jax.ShapeDtypeStruct((BC, HW), x.dtype),
        grid_spec=pltpu.PrefetchScalarGridSpec(
            num_scalar_prefetch=0,
            grid=grid,
            in_specs=[x_spec, vec_spec, vec_spec],
            out_specs=out_spec,
        ),
        compiler_params=pltpu.CompilerParams(
            dimension_semantics=("parallel", "parallel")
        ),
    )(x2, scale_rows, bias_rows)

    return y2.reshape(B, C, H, W)


# --------------------------------- demo -------------------------------------


if __name__ == "__main__":
    B, C, RES = 2, 3, 16  # module's forward implies [*, 3, res, res]
    key = jax.random.PRNGKey(0)
    x = jax.random.uniform(
        key, (B, C, RES, RES), dtype=jnp.float32, minval=-1.0, maxval=1.0
    )

    mean = jnp.asarray([0.485, 0.456, 0.406], jnp.float32)
    std = jnp.asarray([0.229, 0.224, 0.225], jnp.float32)

    out = tensor_transform(x, mean, std)
    out = jax.block_until_ready(out)

    # Reference: exact formula from the PyTorch module (un-folded), with the
    # constant per-channel maps materialized as in __init__.
    mean_map = jnp.broadcast_to(mean[:, None, None], (C, RES, RES))
    std_map = jnp.broadcast_to(std[:, None, None], (C, RES, RES))
    ref = ((x * 0.5 + 0.5) - mean_map[None]) / std_map[None]

    assert out.shape == (B, C, RES, RES)
    # Folding into scale/bias differs from the reference by ~1 ulp.
    assert jnp.allclose(out, ref, atol=1e-5, rtol=1e-5)

    print("KERNEL_OK")
</pallas_src>

<mosaic_0001>
module attributes {stable_mosaic.version = 11 : i64} {
  func.func @_affine_kernel(%arg0: i32, %arg1: i32, %arg2: memref<6x256xf32, #tpu.memory_space<vmem>>, %arg3: memref<6x1xf32, #tpu.memory_space<vmem>>, %arg4: memref<6x1xf32, #tpu.memory_space<vmem>>, %arg5: memref<6x256xf32, #tpu.memory_space<vmem>>) attributes {dimension_semantics = [#tpu.dimension_semantics<parallel>, #tpu.dimension_semantics<parallel>], iteration_bounds = array<i64: 1, 1>, scalar_prefetch = 0 : i64, scratch_operands = 0 : i64, tpu.core_type = #tpu.core_type<tc>, window_params = [{transform_indices = @transform_0, window_bounds = array<i64: 6, 256>}, {transform_indices = @transform_1, window_bounds = array<i64: 6, 1>}, {transform_indices = @transform_2, window_bounds = array<i64: 6, 1>}, {transform_indices = @transform_3, window_bounds = array<i64: 6, 256>}]} {
    %c0 = arith.constant 0 : index
    %c0_0 = arith.constant 0 : index
    %0 = vector.load %arg2[%c0, %c0_0] : memref<6x256xf32, #tpu.memory_space<vmem>>, vector<6x256xf32>
    %c0_1 = arith.constant 0 : index
    %c0_2 = arith.constant 0 : index
    %1 = vector.load %arg3[%c0_1, %c0_2] : memref<6x1xf32, #tpu.memory_space<vmem>>, vector<6x1xf32>
    %2 = vector.broadcast %1 : vector<6x1xf32> to vector<6x256xf32>
    %3 = arith.mulf %0, %2 : vector<6x256xf32>
    %c0_3 = arith.constant 0 : index
    %c0_4 = arith.constant 0 : index
    %4 = vector.load %arg4[%c0_3, %c0_4] : memref<6x1xf32, #tpu.memory_space<vmem>>, vector<6x1xf32>
    %5 = vector.broadcast %4 : vector<6x1xf32> to vector<6x256xf32>
    %6 = arith.addf %3, %5 : vector<6x256xf32>
    %c0_5 = arith.constant 0 : index
    %c0_6 = arith.constant 0 : index
    %7 = vector.load %arg5[%c0_5, %c0_6] : memref<6x256xf32, #tpu.memory_space<vmem>>, vector<6x256xf32>
    tpu.vector_store %arg5[%c0_5, %c0_6], %6 {strides = array<i32>} : memref<6x256xf32, #tpu.memory_space<vmem>>, vector<6x256xf32>,
    return
  }
  func.func @transform_0(%arg0: i32, %arg1: i32) -> (i32, i32) {
    %c0_i32 = arith.constant 0 : i32
    return %arg0, %arg1 : i32, i32
  }
  func.func @transform_1(%arg0: i32, %arg1: i32) -> (i32, i32) {
    %c0_i32 = arith.constant 0 : i32
    %c0_i32_0 = arith.constant 0 : i32
    return %arg0, %c0_i32 : i32, i32
  }
  func.func @transform_2(%arg0: i32, %arg1: i32) -> (i32, i32) {
    %c0_i32 = arith.constant 0 : i32
    %c0_i32_0 = arith.constant 0 : i32
    return %arg0, %c0_i32 : i32, i32
  }
  func.func @transform_3(%arg0: i32, %arg1: i32) -> (i32, i32) {
    %c0_i32 = arith.constant 0 : i32
    return %arg0, %arg1 : i32, i32
  }
}

</mosaic_0001>

<bundles_post_ra>
// kernel: tpu_custom_call.1
= control target key start
LH: loop header
LB: loop body
LE: loop exit
PB: predicated region body
PF: predicated region fallthrough
CT: control target
= control target key end

     0   :  { %v76_v1 = vmov 0   ;;  %s122_s0 = inlined_call_operand.vmem [shape: f32[6,256], index: 0, kind: input, shape index: {}]   ;;  %s123_s1 = inlined_call_operand.vmem [shape: f32[6,1], index: 1, kind: input, shape index: {}]   ;;  %s124_s2 = inlined_call_operand.vmem [shape: f32[6,1], index: 2, kind: input, shape index: {}]   ;;  %s125_s3 = inlined_call_operand.hbm [shape: f32[6,256], index: 3, kind: output, shape index: {}]  }
   0x1   :  { %v17_v0 = vld [vmem:[%s123_s1] sm:$0x3f]  ;;  %51 = vset.pattern.permute.xlu0 %v76_v1 }
   0x2   :  { %8 = vsyncpa [#allocation3], 0  ;;  %20 = vperm.xlu0 %51, %v17_v0   ;;  %v25_v2 = vld [vmem:[%s124_s2] sm:$0x3f]  ;;  %v16_v5 = vld [vmem:[%s122_s0 + $0x8] sm:$0x3f] }
   0x3   :  { %v15_v4 = vld [vmem:[%s122_s0] sm:$0x3f]  ;;  %s77_s20 = smov [#allocation2]  }
   0x4   :  { %s41_s1 = sshll.u32 %s77_s20, 4  ;;  %s42_s1 = int_to_ptr.vmem [resolvable:$true] %s41_s1 }
   0x5   :  { %s52_s2 = scalar_lea.vmem %s42_s1, 256  ;;  %p57_p1 = scmp.lt.s32.totalorder %s42_s1, %s42_s1 }
   0x6   :  { %28 = vperm.xlu0 %51, %v25_v2   ;;  %p53_p0 = scmp.ne.s32.totalorder %s42_s1, %s52_s2  ;;  %p58_p2 = scmp.lt.s32.totalorder %s52_s2, %s52_s2 }
   0x8   :  { %p59_p3 = por %p58_p2, %p57_p1 }
   0xa   :  { %p60_p4 = pnand %p59_p3, %p53_p0 }
  0x81   :  { %v21_v3 = vpop.permute.xlu0 %20 }
  0x82   :  { %v23_v6 = vmul.f32 %v21_v3, %v15_v4  ;;  %v24_v7 = vmul.f32 %v21_v3, %v16_v5 }
  0x85   :  { %v29_v8 = vpop.permute.xlu0 %28 }
  0x86   :  { %v31_v9 = vadd.f32 %v29_v8, %v23_v6  ;;  %v32_v10 = vadd.f32 %v29_v8, %v24_v7 }
  0x88   :  { %33 = vst [vmem:[#allocation2] sm:$0x3f] %v31_v9  ;;  %34 = vst [vmem:[#allocation2 + $0x8] sm:$0x3f] %v32_v10 }
  0x89   :  { %63 = shalt.err (!%p60_p4)
}
  0x8a   :  { %s64_s0 = scalar_lea.hbm %s125_s3, 256 }
  0x8b   :  { %p65_p5 = scmp.ne.s32.totalorder %s125_s3, %s64_s0  ;;  %p68_p6 = scmp.lt.u32.totalorder %s64_s0, %s125_s3 }
  0x8d   :  { %p70_p7 = pnand %p68_p6, %p65_p5 }
  0x8f   :  { %73 = shalt.err (!%p70_p7)
}
  0x90   :  { %44 = dma.vmem_to_hbm [thread:$0]  %s42_s1, 256, %s125_s3, [#allocation3]  }
  0x91   :  { %74 = dma.done.wait [#allocation3], 256  }
  0x92   :  { %75 = vsyncadd [#allocation3], 4294967040 }
  0x93   :  { %48 = vsyncpa [#allocation3], 1 }

</bundles_post_ra>
